<compile_context>
chip_gen: v7x
topology: tpu7x:2x2x1
jax: 0.10.0
libtpu: 0.0.40
codegen_flags: <defaults>
</compile_context>

<pallas_src>
import functools

import jax
import jax.numpy as jnp
from jax.experimental import pallas as pl
from jax.experimental.pallas import tpu as pltpu

NEG_SLOPE = 0.01  # torch.nn.LeakyReLU default


def _lrelu(x):
    # maximum(x, a*x) == LeakyReLU for 0 < a < 1 (mul+max instead of cmp+mul+sel)
    return jnp.maximum(x, NEG_SLOPE * x)


# --------------------------------------------------------------------------
# Fused Pallas kernel: all blocks + classifier in one invocation
# --------------------------------------------------------------------------
def fused_dilated_cnn_kernel(*refs, block_cfgs, T, TP):
    """refs = [x, (wa, b1, wb, b2, br) per block ..., w_cls, b_cls, out]."""
    n_blocks = len(block_cfgs)
    x_ref = refs[0]
    blk_refs = refs[1:1 + 5 * n_blocks]
    wcls_ref = refs[1 + 5 * n_blocks]
    bcls_ref = refs[2 + 5 * n_blocks]
    o_ref = refs[3 + 5 * n_blocks]

    # One (1, TP) lane iota; per-unique-shift 0/1 float masks built ONCE and
    # reused by every conv of every block (no per-call iota/broadcast rebuild).
    lane = jax.lax.broadcasted_iota(jnp.int32, (1, TP), 1)
    shifts = sorted({s for (d, _) in block_cfgs for s in (d, 2 * d)})
    maskf = {s: (lane >= s).astype(jnp.float32) for s in shifts}

    def causal_shift(v, s):
        # out[:, t] = v[:, t - s] for t >= s, 0 for t < s (== ConstantPad1d left pad).
        # pltpu.roll is circular: the lane mask zeroing t < s is mandatory,
        # because the wrapped-in lanes come from the padded tail.
        if s == 0:
            return v
        return pltpu.roll(v, shift=s, axis=1) * maskf[s]

    h = x_ref[...]                                               # (C0, TP), f32
    for bi, (d, c_out) in enumerate(block_cfgs):
        wa_ref, b1_ref, wb_ref, b2_ref, br_ref = blk_refs[5 * bi:5 * bi + 5]

        # conv1 (3 taps) + 1x1 residual conv: ONE bf16 matmul (weights row-stacked,
        # row-slice boundaries are multiples of 8 sublanes -> free views).
        z = jnp.dot(wa_ref[...], h.astype(jnp.bfloat16),
                    preferred_element_type=jnp.float32)          # (4*c_out, TP) f32
        p1 = (causal_shift(z[0:c_out], 2 * d)
              + causal_shift(z[c_out:2 * c_out], d)
              + z[2 * c_out:3 * c_out]
              + b1_ref[...])
        h1 = _lrelu(p1)                                          # Dropout(0.1): identity (eval)
        res = z[3 * c_out:4 * c_out] + br_ref[...]               # 1x1 residual pre-act

        # conv2 (3 taps): ONE bf16 matmul.
        z2 = jnp.dot(wb_ref[...], h1.astype(jnp.bfloat16),
                     preferred_element_type=jnp.float32)         # (3*c_out, TP) f32
        p2 = (causal_shift(z2[0:c_out], 2 * d)
              + causal_shift(z2[c_out:2 * c_out], d)
              + z2[2 * c_out:3 * c_out]
              + b2_ref[...])
        h2 = _lrelu(p2)                                          # Dropout(0.1): identity (eval)

        # PyTorch block: self.relu(network(x) + resize(x))  -> double activation on h2
        h = _lrelu(h2 + res)

    # Classifier: mean over the T valid time columns FIRST (masking the padded
    # tail), then a tiny f32 matvec.  (mean_t(Wx+b) == W*mean_t(x)+b).
    tmaskf = (lane < T).astype(jnp.float32)
    xbar = jnp.sum(h * tmaskf, axis=1, keepdims=True) * (1.0 / T)   # (C_last, 1)
    o_ref[...] = (jnp.dot(wcls_ref[...], xbar,
                          preferred_element_type=jnp.float32) + bcls_ref[...])


# --------------------------------------------------------------------------
# Wrapper (single pallas_call for the whole network)
# --------------------------------------------------------------------------
_VMEM = pl.BlockSpec(memory_space=pltpu.MemorySpace.VMEM)


def dilated_cnn_forward(X, enc_state, blocks, cls_w, cls_b, max_seq, num_emb):
    """blocks: list of (W_a, b1, W_b, b2, br, dilation) per CausalConv1dBlock (f32)."""
    # new_x = zeros((1, C, T_in+1)); new_x[0,:,0] = enc_state; new_x[0,:,1:] = X
    h0 = jnp.concatenate([enc_state[:, None], X[0]], axis=1).astype(jnp.float32)  # (C0, T)
    _, T = h0.shape
    TP = ((T + 127) // 128) * 128
    h0 = jnp.pad(h0, ((0, 0), (0, TP - T)))                       # lane-dense (C0, TP)

    operands = [h0]
    block_cfgs = []
    flops = 0
    c_prev = h0.shape[0]
    for (wa, b1, wb, b2, br, d) in blocks:
        c_out = wb.shape[0] // 3
        block_cfgs.append((int(d), int(c_out)))
        # bf16 matmul operands (MXU-native); biases stay f32, accumulation f32.
        operands += [wa.astype(jnp.bfloat16), b1, wb.astype(jnp.bfloat16), b2, br]
        flops += 2 * wa.shape[0] * wa.shape[1] * TP               # stacked conv1 + residual
        flops += 2 * wb.shape[0] * wb.shape[1] * TP               # stacked conv2
        c_prev = c_out
    c_cls = cls_w.shape[0]
    operands += [cls_w, cls_b]
    flops += 2 * c_cls * c_prev                                   # classifier matvec

    bytes_accessed = sum(int(o.size) * o.dtype.itemsize for o in operands) + c_cls * 4

    kernel = functools.partial(fused_dilated_cnn_kernel,
                               block_cfgs=tuple(block_cfgs), T=int(T), TP=int(TP))
    # Grid-less: at this config everything (weights + activations) is a few KB
    # and stays VMEM-resident.  Production scale would add a halo-ed time-tile
    # grid ("parallel") with resident-weight index_maps + vmem_limit_bytes.
    out = pl.pallas_call(
        kernel,
        out_shape=jax.ShapeDtypeStruct((c_cls, 1), jnp.float32),
        in_specs=[_VMEM] * len(operands),
        out_specs=_VMEM,
        cost_estimate=pl.CostEstimate(flops=int(flops), transcendentals=0,
                                      bytes_accessed=int(bytes_accessed)),
    )(*operands)
    return out[:, 0].reshape(max_seq, num_emb)


# --------------------------------------------------------------------------
# Pure-JAX reference (f32) for correctness validation
# --------------------------------------------------------------------------
def reference_forward(X, enc_state, blocks, cls_w, cls_b, max_seq, num_emb):
    h = jnp.concatenate([enc_state[:, None], X[0]], axis=1).astype(jnp.float32)
    T = h.shape[1]

    def shift(v, s):
        return jnp.pad(v, ((0, 0), (s, 0)))[:, :T]

    for (wa, b1, wb, b2, br, d) in blocks:
        c = wb.shape[0] // 3
        z = wa @ h
        p1 = shift(z[0:c], 2 * d) + shift(z[c:2 * c], d) + z[2 * c:3 * c] + b1
        h1 = jnp.where(p1 > 0, p1, NEG_SLOPE * p1)
        res = z[3 * c:4 * c] + br
        z2 = wb @ h1
        p2 = shift(z2[0:c], 2 * d) + shift(z2[c:2 * c], d) + z2[2 * c:3 * c] + b2
        h2 = jnp.where(p2 > 0, p2, NEG_SLOPE * p2)
        s = h2 + res
        h = jnp.where(s > 0, s, NEG_SLOPE * s)
    xbar = jnp.mean(h, axis=1, keepdims=True)
    return (cls_w @ xbar + cls_b)[:, 0].reshape(max_seq, num_emb)


# --------------------------------------------------------------------------
# Deterministic parameter construction (weight_norm forward semantics)
# --------------------------------------------------------------------------
def make_wn_conv_weight(key, c_in, c_out, k):
    """Effective weight of weight_norm(Conv1d): w = g * v / ||v|| (dim=0)."""
    kv, kg, kb = jax.random.split(key, 3)
    v = jax.random.normal(kv, (c_out, c_in, k), jnp.float32) * 0.1
    g = 1.0 + 0.1 * jax.random.normal(kg, (c_out,), jnp.float32)
    norm = jnp.sqrt(jnp.sum(v * v, axis=(1, 2), keepdims=True))
    w = g[:, None, None] * v / norm                              # (c_out, c_in, k)
    b = jax.random.normal(kb, (c_out,), jnp.float32) * 0.1
    return w, b


def make_block_params(key, c_in, c_out, dilation):
    # Hard constraint: keep stacked row-slice boundaries sublane-aligned.
    assert c_out % 8 == 0, "c_out must be a multiple of 8 (sublane alignment)"
    k1, k2, k3, k4 = jax.random.split(key, 4)
    w1, b1 = make_wn_conv_weight(k1, c_in, c_out, 3)
    w2, b2 = make_wn_conv_weight(k2, c_out, c_out, 3)
    wr = jax.random.normal(k3, (c_out, c_in), jnp.float32) * 0.1
    br = jax.random.normal(k4, (c_out,), jnp.float32) * 0.1
    # Row-stack taps (+ the 1x1 residual into conv1's matmul):
    #   z = W_a @ x ; conv1 = shift(z[0:C],2d) + shift(z[C:2C],d) + z[2C:3C]
    #   residual = z[3C:4C]
    wa = jnp.concatenate([w1[:, :, 0], w1[:, :, 1], w1[:, :, 2], wr], axis=0)
    wb = jnp.concatenate([w2[:, :, 0], w2[:, :, 1], w2[:, :, 2]], axis=0)
    return (wa, b1[:, None], wb, b2[:, None], br[:, None], dilation)


if __name__ == "__main__":
    # Small config: DilatedCNN(max_sequence_length=8, num_embeddings=4, layers=[16, 16])
    max_seq, num_emb = 8, 4
    layers = [16, 16]
    T_in = 15                 # X: (1, max_seq, T_in); enc_state prepended -> T = 16

    key = jax.random.PRNGKey(0)
    keys = jax.random.split(key, len(layers) + 3)

    blocks = []
    c = max_seq
    d = 1
    for i, l in enumerate(layers):
        blocks.append(make_block_params(keys[i], c, l, d))
        d *= 2
        c = l

    kcls, kx, ke = keys[len(layers):]
    c_cls = max_seq * num_emb
    cls_w = jax.random.normal(jax.random.fold_in(kcls, 0), (c_cls, c), jnp.float32) * 0.1
    cls_b = (jax.random.normal(jax.random.fold_in(kcls, 1), (c_cls,), jnp.float32) * 0.1)[:, None]

    X = jax.random.normal(kx, (1, max_seq, T_in), jnp.float32)
    enc_state = jax.random.normal(ke, (max_seq,), jnp.float32)

    out = dilated_cnn_forward(X, enc_state, blocks, cls_w, cls_b, max_seq, num_emb)
    out = jax.block_until_ready(out)
    assert out.shape == (max_seq, num_emb)
    assert bool(jnp.all(jnp.isfinite(out)))

    # Validate against the pure-JAX f32 reference (loosened tolerance for the
    # bf16 matmul operands; accumulation is f32 in both paths).
    ref = reference_forward(X, enc_state, blocks, cls_w, cls_b, max_seq, num_emb)
    max_err = float(jnp.max(jnp.abs(out - ref)))
    assert max_err < 5e-2, f"kernel vs reference mismatch: {max_err}"

    print("KERNEL_OK")
</pallas_src>

<mosaic_0001>
module attributes {stable_mosaic.version = 11 : i64} {
  func.func @fused_dilated_cnn_kernel(%arg0: memref<8x128xf32, #tpu.memory_space<vmem>>, %arg1: memref<64x8xbf16, #tpu.memory_space<vmem>>, %arg2: memref<16x1xf32, #tpu.memory_space<vmem>>, %arg3: memref<48x16xbf16, #tpu.memory_space<vmem>>, %arg4: memref<16x1xf32, #tpu.memory_space<vmem>>, %arg5: memref<16x1xf32, #tpu.memory_space<vmem>>, %arg6: memref<64x16xbf16, #tpu.memory_space<vmem>>, %arg7: memref<16x1xf32, #tpu.memory_space<vmem>>, %arg8: memref<48x16xbf16, #tpu.memory_space<vmem>>, %arg9: memref<16x1xf32, #tpu.memory_space<vmem>>, %arg10: memref<16x1xf32, #tpu.memory_space<vmem>>, %arg11: memref<32x16xf32, #tpu.memory_space<vmem>>, %arg12: memref<32x1xf32, #tpu.memory_space<vmem>>, %arg13: memref<32x1xf32, #tpu.memory_space<vmem>>) attributes {dimension_semantics = [], scalar_prefetch = 0 : i64, scratch_operands = 0 : i64, tpu.core_type = #tpu.core_type<tc>} {
    %0 = tpu.iota {dimensions = array<i32: 1>} : vector<1x128xi32>
    %c1_i32 = arith.constant 1 : i32
    %1 = vector.broadcast %c1_i32 : i32 to vector<1x128xi32>
    %2 = arith.cmpi sge, %0, %1 : vector<1x128xi32>
    %3 = arith.extui %2 : vector<1x128xi1> to vector<1x128xi32>
    %4 = arith.sitofp %3 : vector<1x128xi32> to vector<1x128xf32>
    %c2_i32 = arith.constant 2 : i32
    %5 = vector.broadcast %c2_i32 : i32 to vector<1x128xi32>
    %6 = arith.cmpi sge, %0, %5 : vector<1x128xi32>
    %7 = arith.extui %6 : vector<1x128xi1> to vector<1x128xi32>
    %8 = arith.sitofp %7 : vector<1x128xi32> to vector<1x128xf32>
    %c4_i32 = arith.constant 4 : i32
    %9 = vector.broadcast %c4_i32 : i32 to vector<1x128xi32>
    %10 = arith.cmpi sge, %0, %9 : vector<1x128xi32>
    %11 = arith.extui %10 : vector<1x128xi1> to vector<1x128xi32>
    %12 = arith.sitofp %11 : vector<1x128xi32> to vector<1x128xf32>
    %c0 = arith.constant 0 : index
    %c0_0 = arith.constant 0 : index
    %13 = vector.load %arg0[%c0, %c0_0] : memref<8x128xf32, #tpu.memory_space<vmem>>, vector<8x128xf32>
    %c0_1 = arith.constant 0 : index
    %c0_2 = arith.constant 0 : index
    %14 = vector.load %arg1[%c0_1, %c0_2] : memref<64x8xbf16, #tpu.memory_space<vmem>>, vector<64x8xbf16>
    %15 = arith.truncf %13 : vector<8x128xf32> to vector<8x128xbf16>
    %cst = arith.constant dense<0.000000e+00> : vector<64x128xf32>
    %16 = tpu.matmul %14, %15, %cst {dimension_numbers = #tpu.dot_dimension_numbers<[1], [0], [0], [1], [0, 0, 1, 1], [], []>} : vector<64x8xbf16>, vector<8x128xbf16>, vector<64x128xf32> -> vector<64x128xf32>
    %17 = vector.extract_strided_slice %16 {offsets = [0, 0], sizes = [16, 128], strides = [1, 1]} : vector<64x128xf32> to vector<16x128xf32>
    %c2_i32_3 = arith.constant 2 : i32
    %18 = tpu.dynamic_rotate %17 by %c2_i32_3 dim 1 : vector<16x128xf32>, i32 -> vector<16x128xf32>
    %19 = vector.broadcast %8 : vector<1x128xf32> to vector<16x128xf32>
    %20 = arith.mulf %18, %19 : vector<16x128xf32>
    %21 = vector.extract_strided_slice %16 {offsets = [16, 0], sizes = [16, 128], strides = [1, 1]} : vector<64x128xf32> to vector<16x128xf32>
    %c1_i32_4 = arith.constant 1 : i32
    %22 = tpu.dynamic_rotate %21 by %c1_i32_4 dim 1 : vector<16x128xf32>, i32 -> vector<16x128xf32>
    %23 = vector.broadcast %4 : vector<1x128xf32> to vector<16x128xf32>
    %24 = arith.mulf %22, %23 : vector<16x128xf32>
    %25 = arith.addf %20, %24 : vector<16x128xf32>
    %26 = vector.extract_strided_slice %16 {offsets = [32, 0], sizes = [16, 128], strides = [1, 1]} : vector<64x128xf32> to vector<16x128xf32>
    %27 = arith.addf %25, %26 : vector<16x128xf32>
    %c0_5 = arith.constant 0 : index
    %c0_6 = arith.constant 0 : index
    %28 = vector.load %arg2[%c0_5, %c0_6] : memref<16x1xf32, #tpu.memory_space<vmem>>, vector<16x1xf32>
    %29 = vector.broadcast %28 : vector<16x1xf32> to vector<16x128xf32>
    %30 = arith.addf %27, %29 : vector<16x128xf32>
    %cst_7 = arith.constant 0.00999999977 : f32
    %31 = vector.broadcast %cst_7 : f32 to vector<16x128xf32>
    %32 = arith.mulf %31, %30 : vector<16x128xf32>
    %33 = arith.maximumf %30, %32 : vector<16x128xf32>
    %34 = vector.extract_strided_slice %16 {offsets = [48, 0], sizes = [16, 128], strides = [1, 1]} : vector<64x128xf32> to vector<16x128xf32>
    %c0_8 = arith.constant 0 : index
    %c0_9 = arith.constant 0 : index
    %35 = vector.load %arg5[%c0_8, %c0_9] : memref<16x1xf32, #tpu.memory_space<vmem>>, vector<16x1xf32>
    %36 = vector.broadcast %35 : vector<16x1xf32> to vector<16x128xf32>
    %37 = arith.addf %34, %36 : vector<16x128xf32>
    %c0_10 = arith.constant 0 : index
    %c0_11 = arith.constant 0 : index
    %38 = vector.load %arg3[%c0_10, %c0_11] : memref<48x16xbf16, #tpu.memory_space<vmem>>, vector<48x16xbf16>
    %39 = arith.truncf %33 : vector<16x128xf32> to vector<16x128xbf16>
    %cst_12 = arith.constant dense<0.000000e+00> : vector<48x128xf32>
    %40 = tpu.matmul %38, %39, %cst_12 {dimension_numbers = #tpu.dot_dimension_numbers<[1], [0], [0], [1], [0, 0, 1, 1], [], []>} : vector<48x16xbf16>, vector<16x128xbf16>, vector<48x128xf32> -> vector<48x128xf32>
    %41 = vector.extract_strided_slice %40 {offsets = [0, 0], sizes = [16, 128], strides = [1, 1]} : vector<48x128xf32> to vector<16x128xf32>
    %c2_i32_13 = arith.constant 2 : i32
    %42 = tpu.dynamic_rotate %41 by %c2_i32_13 dim 1 : vector<16x128xf32>, i32 -> vector<16x128xf32>
    %43 = vector.broadcast %8 : vector<1x128xf32> to vector<16x128xf32>
    %44 = arith.mulf %42, %43 : vector<16x128xf32>
    %45 = vector.extract_strided_slice %40 {offsets = [16, 0], sizes = [16, 128], strides = [1, 1]} : vector<48x128xf32> to vector<16x128xf32>
    %c1_i32_14 = arith.constant 1 : i32
    %46 = tpu.dynamic_rotate %45 by %c1_i32_14 dim 1 : vector<16x128xf32>, i32 -> vector<16x128xf32>
    %47 = vector.broadcast %4 : vector<1x128xf32> to vector<16x128xf32>
    %48 = arith.mulf %46, %47 : vector<16x128xf32>
    %49 = arith.addf %44, %48 : vector<16x128xf32>
    %50 = vector.extract_strided_slice %40 {offsets = [32, 0], sizes = [16, 128], strides = [1, 1]} : vector<48x128xf32> to vector<16x128xf32>
    %51 = arith.addf %49, %50 : vector<16x128xf32>
    %c0_15 = arith.constant 0 : index
    %c0_16 = arith.constant 0 : index
    %52 = vector.load %arg4[%c0_15, %c0_16] : memref<16x1xf32, #tpu.memory_space<vmem>>, vector<16x1xf32>
    %53 = vector.broadcast %52 : vector<16x1xf32> to vector<16x128xf32>
    %54 = arith.addf %51, %53 : vector<16x128xf32>
    %cst_17 = arith.constant 0.00999999977 : f32
    %55 = vector.broadcast %cst_17 : f32 to vector<16x128xf32>
    %56 = arith.mulf %55, %54 : vector<16x128xf32>
    %57 = arith.maximumf %54, %56 : vector<16x128xf32>
    %58 = arith.addf %57, %37 : vector<16x128xf32>
    %cst_18 = arith.constant 0.00999999977 : f32
    %59 = vector.broadcast %cst_18 : f32 to vector<16x128xf32>
    %60 = arith.mulf %59, %58 : vector<16x128xf32>
    %61 = arith.maximumf %58, %60 : vector<16x128xf32>
    %c0_19 = arith.constant 0 : index
    %c0_20 = arith.constant 0 : index
    %62 = vector.load %arg6[%c0_19, %c0_20] : memref<64x16xbf16, #tpu.memory_space<vmem>>, vector<64x16xbf16>
    %63 = arith.truncf %61 : vector<16x128xf32> to vector<16x128xbf16>
    %cst_21 = arith.constant dense<0.000000e+00> : vector<64x128xf32>
    %64 = tpu.matmul %62, %63, %cst_21 {dimension_numbers = #tpu.dot_dimension_numbers<[1], [0], [0], [1], [0, 0, 1, 1], [], []>} : vector<64x16xbf16>, vector<16x128xbf16>, vector<64x128xf32> -> vector<64x128xf32>
    %65 = vector.extract_strided_slice %64 {offsets = [0, 0], sizes = [16, 128], strides = [1, 1]} : vector<64x128xf32> to vector<16x128xf32>
    %c4_i32_22 = arith.constant 4 : i32
    %66 = tpu.dynamic_rotate %65 by %c4_i32_22 dim 1 : vector<16x128xf32>, i32 -> vector<16x128xf32>
    %67 = vector.broadcast %12 : vector<1x128xf32> to vector<16x128xf32>
    %68 = arith.mulf %66, %67 : vector<16x128xf32>
    %69 = vector.extract_strided_slice %64 {offsets = [16, 0], sizes = [16, 128], strides = [1, 1]} : vector<64x128xf32> to vector<16x128xf32>
    %c2_i32_23 = arith.constant 2 : i32
    %70 = tpu.dynamic_rotate %69 by %c2_i32_23 dim 1 : vector<16x128xf32>, i32 -> vector<16x128xf32>
    %71 = vector.broadcast %8 : vector<1x128xf32> to vector<16x128xf32>
    %72 = arith.mulf %70, %71 : vector<16x128xf32>
    %73 = arith.addf %68, %72 : vector<16x128xf32>
    %74 = vector.extract_strided_slice %64 {offsets = [32, 0], sizes = [16, 128], strides = [1, 1]} : vector<64x128xf32> to vector<16x128xf32>
    %75 = arith.addf %73, %74 : vector<16x128xf32>
    %c0_24 = arith.constant 0 : index
    %c0_25 = arith.constant 0 : index
    %76 = vector.load %arg7[%c0_24, %c0_25] : memref<16x1xf32, #tpu.memory_space<vmem>>, vector<16x1xf32>
    %77 = vector.broadcast %76 : vector<16x1xf32> to vector<16x128xf32>
    %78 = arith.addf %75, %77 : vector<16x128xf32>
    %cst_26 = arith.constant 0.00999999977 : f32
    %79 = vector.broadcast %cst_26 : f32 to vector<16x128xf32>
    %80 = arith.mulf %79, %78 : vector<16x128xf32>
    %81 = arith.maximumf %78, %80 : vector<16x128xf32>
    %82 = vector.extract_strided_slice %64 {offsets = [48, 0], sizes = [16, 128], strides = [1, 1]} : vector<64x128xf32> to vector<16x128xf32>
    %c0_27 = arith.constant 0 : index
    %c0_28 = arith.constant 0 : index
    %83 = vector.load %arg10[%c0_27, %c0_28] : memref<16x1xf32, #tpu.memory_space<vmem>>, vector<16x1xf32>
    %84 = vector.broadcast %83 : vector<16x1xf32> to vector<16x128xf32>
    %85 = arith.addf %82, %84 : vector<16x128xf32>
    %c0_29 = arith.constant 0 : index
    %c0_30 = arith.constant 0 : index
    %86 = vector.load %arg8[%c0_29, %c0_30] : memref<48x16xbf16, #tpu.memory_space<vmem>>, vector<48x16xbf16>
    %87 = arith.truncf %81 : vector<16x128xf32> to vector<16x128xbf16>
    %cst_31 = arith.constant dense<0.000000e+00> : vector<48x128xf32>
    %88 = tpu.matmul %86, %87, %cst_31 {dimension_numbers = #tpu.dot_dimension_numbers<[1], [0], [0], [1], [0, 0, 1, 1], [], []>} : vector<48x16xbf16>, vector<16x128xbf16>, vector<48x128xf32> -> vector<48x128xf32>
    %89 = vector.extract_strided_slice %88 {offsets = [0, 0], sizes = [16, 128], strides = [1, 1]} : vector<48x128xf32> to vector<16x128xf32>
    %c4_i32_32 = arith.constant 4 : i32
    %90 = tpu.dynamic_rotate %89 by %c4_i32_32 dim 1 : vector<16x128xf32>, i32 -> vector<16x128xf32>
    %91 = vector.broadcast %12 : vector<1x128xf32> to vector<16x128xf32>
    %92 = arith.mulf %90, %91 : vector<16x128xf32>
    %93 = vector.extract_strided_slice %88 {offsets = [16, 0], sizes = [16, 128], strides = [1, 1]} : vector<48x128xf32> to vector<16x128xf32>
    %c2_i32_33 = arith.constant 2 : i32
    %94 = tpu.dynamic_rotate %93 by %c2_i32_33 dim 1 : vector<16x128xf32>, i32 -> vector<16x128xf32>
    %95 = vector.broadcast %8 : vector<1x128xf32> to vector<16x128xf32>
    %96 = arith.mulf %94, %95 : vector<16x128xf32>
    %97 = arith.addf %92, %96 : vector<16x128xf32>
    %98 = vector.extract_strided_slice %88 {offsets = [32, 0], sizes = [16, 128], strides = [1, 1]} : vector<48x128xf32> to vector<16x128xf32>
    %99 = arith.addf %97, %98 : vector<16x128xf32>
    %c0_34 = arith.constant 0 : index
    %c0_35 = arith.constant 0 : index
    %100 = vector.load %arg9[%c0_34, %c0_35] : memref<16x1xf32, #tpu.memory_space<vmem>>, vector<16x1xf32>
    %101 = vector.broadcast %100 : vector<16x1xf32> to vector<16x128xf32>
    %102 = arith.addf %99, %101 : vector<16x128xf32>
    %cst_36 = arith.constant 0.00999999977 : f32
    %103 = vector.broadcast %cst_36 : f32 to vector<16x128xf32>
    %104 = arith.mulf %103, %102 : vector<16x128xf32>
    %105 = arith.maximumf %102, %104 : vector<16x128xf32>
    %106 = arith.addf %105, %85 : vector<16x128xf32>
    %cst_37 = arith.constant 0.00999999977 : f32
    %107 = vector.broadcast %cst_37 : f32 to vector<16x128xf32>
    %108 = arith.mulf %107, %106 : vector<16x128xf32>
    %109 = arith.maximumf %106, %108 : vector<16x128xf32>
    %c16_i32 = arith.constant 16 : i32
    %110 = vector.broadcast %c16_i32 : i32 to vector<1x128xi32>
    %111 = arith.cmpi slt, %0, %110 : vector<1x128xi32>
    %112 = arith.extui %111 : vector<1x128xi1> to vector<1x128xi32>
    %113 = arith.sitofp %112 : vector<1x128xi32> to vector<1x128xf32>
    %114 = vector.broadcast %113 : vector<1x128xf32> to vector<16x128xf32>
    %115 = arith.mulf %109, %114 : vector<16x128xf32>
    %cst_38 = arith.constant dense<0.000000e+00> : vector<16xf32>
    %116 = vector.multi_reduction <add>, %115, %cst_38 [1] : vector<16x128xf32> to vector<16xf32>
    %117 = vector.shape_cast %116 : vector<16xf32> to vector<16x1xf32>
    %cst_39 = arith.constant 6.250000e-02 : f32
    %118 = vector.broadcast %cst_39 : f32 to vector<16x1xf32>
    %119 = arith.mulf %117, %118 : vector<16x1xf32>
    %c0_40 = arith.constant 0 : index
    %c0_41 = arith.constant 0 : index
    %120 = vector.load %arg11[%c0_40, %c0_41] : memref<32x16xf32, #tpu.memory_space<vmem>>, vector<32x16xf32>
    %cst_42 = arith.constant dense<0.000000e+00> : vector<32x1xf32>
    %121 = tpu.matmul %120, %119, %cst_42 {dimension_numbers = #tpu.dot_dimension_numbers<[1], [0], [0], [1], [0, 0, 1, 1], [], []>} : vector<32x16xf32>, vector<16x1xf32>, vector<32x1xf32> -> vector<32x1xf32>
    %c0_43 = arith.constant 0 : index
    %c0_44 = arith.constant 0 : index
    %122 = vector.load %arg12[%c0_43, %c0_44] : memref<32x1xf32, #tpu.memory_space<vmem>>, vector<32x1xf32>
    %123 = arith.addf %121, %122 : vector<32x1xf32>
    %c0_45 = arith.constant 0 : index
    %c0_46 = arith.constant 0 : index
    %124 = vector.load %arg13[%c0_45, %c0_46] : memref<32x1xf32, #tpu.memory_space<vmem>>, vector<32x1xf32>
    tpu.vector_store %arg13[%c0_45, %c0_46], %123 {strides = array<i32>} : memref<32x1xf32, #tpu.memory_space<vmem>>, vector<32x1xf32>,
    return
  }
}

</mosaic_0001>

<bundles_post_ra>
// kernel: tpu_custom_call.1
= control target key start
LH: loop header
LB: loop body
LE: loop exit
PB: predicated region body
PF: predicated region fallthrough
CT: control target
= control target key end

     0   :  { %vm99_vm0 = vcmask 1043456   ;;  %vm86_vm1 = vcmask 64512   ;;  %v897_v1 = vmov 0   ;;  %v898_v10 = vmov 0.0   ;;  %s899_s21 = smov 1   ;;  %s902_s24 = smov 4   ;;  %s1176_s0 = inlined_call_operand.vmem [shape: f32[8,128], index: 0, kind: input, shape index: {}]   ;;  %s1177_s1 = inlined_call_operand.vmem [shape: bf16[64,8], index: 1, kind: input, shape index: {}]   ;;  %s1178_s2 = inlined_call_operand.vmem [shape: f32[16,1], index: 2, kind: input, shape index: {}]   ;;  %s1179_s4 = inlined_call_operand.vmem [shape: f32[16,1], index: 4, kind: input, shape index: {}]   ;;  %s1180_s3 = inlined_call_operand.vmem [shape: bf16[48,16], index: 3, kind: input, shape index: {}]   ;;  %s1181_s5 = inlined_call_operand.vmem [shape: f32[16,1], index: 5, kind: input, shape index: {}]   ;;  %s1182_s7 = inlined_call_operand.vmem [shape: f32[16,1], index: 7, kind: input, shape index: {}]   ;;  %s1183_s6 = inlined_call_operand.vmem [shape: bf16[64,16], index: 6, kind: input, shape index: {}]   ;;  %s1184_s9 = inlined_call_operand.vmem [shape: f32[16,1], index: 9, kind: input, shape index: {}]   ;;  %s1185_s8 = inlined_call_operand.vmem [shape: bf16[48,16], index: 8, kind: input, shape index: {}]   ;;  %s1186_s10 = inlined_call_operand.vmem [shape: f32[16,1], index: 10, kind: input, shape index: {}]   ;;  %s1187_s11 = inlined_call_operand.vmem [shape: f32[32,16], index: 11, kind: input, shape index: {}]   ;;  %s1188_s12 = inlined_call_operand.vmem [shape: f32[32,1], index: 12, kind: input, shape index: {}]   ;;  %s1189_s13 = inlined_call_operand.vmem [shape: f32[32,1], index: 13, kind: output, shape index: {}]  }
   0x1   :  { %v56_v0 = vld [vmem:[%s1176_s0] sm:$0xff]  ;;  %881 = vset.pattern.permute.xlu0 %v897_v1  ;;  %882 = vset.pattern.permute.xlu1 %v897_v1  ;;  %v884_v5 = vld [vmem:[%s1177_s1 + $0x8] sm:$0xff]   ;;  %v885_v6 = vld [vmem:[%s1177_s1 + $0x10] sm:$0xff]   ;;  %vm901_vm2 = vmmov 0   ;;  %v45_v21 = vlaneseq  ;;  %vm238_vm5 = vcmask 130048   ;;  %vm743_vm8 = vcmask 7168  }
   0x2   :  { %v65_v2 = vpack.c.bf16 %v56_v0, %v56_v0  ;;  %v883_v3 = vld [vmem:[%s1177_s1] sm:$0xff]   ;;  %v185_v8 = vld [vmem:[%s1178_s2 + $0x8] sm:$0xff]  ;;  %v886_v9 = vld [vmem:[%s1177_s1 + $0x18] sm:$0xff]   ;;  %822 = vmatprep.subr.bf16.mxu1 %v898_v10  ;;  %824 = vmatprep.mubr.msk.bf16.mxu1 %vm901_vm2, %v898_v10 }
   0x3   :  { %814 = vmatprep.mubr.msk.bf16.mxu0 %vm86_vm1, %v883_v3  ;;  %v184_v7 = vld [vmem:[%s1178_s2] sm:$0xff]  ;;  %s900_s2 = smov 2   ;;  %v322_v20 = vld [vmem:[%s1179_s4 + $0x8] sm:$0xff]  ;;  %v1015_v23 = vand.u32 127, %v45_v21  ;;  %v889_v48 = vld [vmem:[%s1180_s3 + $0x10] sm:$0xff]  }
   0x4   :  { %874 = vmatprep.subr.msk.bf16.mxu0 %vm99_vm0, %v65_v2  ;;  %v101_v4 = vsel %vm99_vm0, %v65_v2, 0  ;;  %188 = vperm.xlu0 %881, %v184_v7   ;;  %v321_v14 = vld [vmem:[%s1179_s4] sm:$0xff]  ;;  %v888_v47 = vld [vmem:[%s1180_s3 + $0x8] sm:$0xff]  }
   0x5   :  { %813 = vmatpush3.bf16.msra.mxu0 %v101_v4  ;;  %vm47_vm3 = vcmp.ge.s32.totalorder %v1015_v23, 1  ;;  %vm50_vm4 = vcmp.ge.s32.totalorder %v1015_v23, 2  ;;  %v887_v46 = vld [vmem:[%s1180_s3] sm:$0xff]   ;;  %v203_v58 = vld [vmem:[%s1181_s5 + $0x8] sm:$0xff]  ;;  %vm53_vm6 = vcmp.ge.s32.totalorder %v1015_v23, 4  ;;  %vm627_vm7 = vcmp.lt.s32.totalorder %v1015_v23, 16 }
   0x6   :  { %v1020_v25 = vsel %vm47_vm3, 1.0, %v898_v10  ;;  %v1023_v26 = vsel %vm50_vm4, 1.0, %v898_v10  ;;  %v202_v56 = vld [vmem:[%s1181_s5] sm:$0xff]  ;;  %v468_v60 = vld [vmem:[%s1182_s7 + $0x8] sm:$0xff] }
   0x7   :  { %v467_v59 = vld [vmem:[%s1182_s7] sm:$0xff] }
   0x8   :  { %815 = vmatmul.mubr.msk.bf16.vlgmr.msra.gmra.mrb[0].mxu0 %vm86_vm1, %v884_v5  ;;  %193 = vperm.xlu0 %881, %v185_v8   ;;  %v890_v1 = vld [vmem:[%s1183_s6] sm:$0xff]  }
   0x9   :  { %818 = vmatprep.mubr.msk.bf16.mxu0 %vm86_vm1, %v885_v6 }
  0x10   :  { %819 = vmatmul.mubr.msk.bf16.gmra.mrb[4].mxu0 %vm86_vm1, %v886_v9 }
  0x11   :  { %838 = vmatprep.mubr.msk.bf16.mxu0 %vm238_vm5, %v890_v1 }
  0x83   :  { %v189_v22 = vpop.permute.xlu0 %188 }
  0x87   :  { %v194_v24 = vpop.permute.xlu0 %193 }
  0xdb   :  { %v816_v11 = vpop.f32.mrb[0].mxu0 }
  0xdc   :  { %174 = vrot.lane.b32.xlu0 %v816_v11, %s899_s21  ;;  %v137_v12 = vpop.f32.mrb[1].mxu0 }
  0xdd   :  { %168 = vrot.lane.b32.xlu1 %v137_v12, %s900_s2  ;;  %v817_v13 = vpop.f32.mrb[2].mxu0 }
  0xde   :  { %v140_v15 = vpop.f32.mrb[3].mxu0 }
  0xe0   :  { %325 = vperm.xlu0 %881, %v321_v14  }
  0xe1   :  { %170 = vrot.lane.b32.xlu1 %v140_v15, %s900_s2 }
  0xe3   :  { %v1005_v16 = vpop.f32.mrb[4].mxu0 }
  0xe4   :  { %v153_v17 = vpop.f32.mrb[5].mxu0 }
  0xe5   :  { %176 = vrot.lane.b32.xlu1 %v817_v13, %s899_s21  ;;  %v1008_v18 = vpop.f32.mrb[6].mxu0 }
  0xe6   :  { %v156_v19 = vpop.f32.mrb[7].mxu0 }
  0xe9   :  { %330 = vperm.xlu1 %882, %v322_v20  }
 0x14e   :  { %v175_v27 = vpop.permute.xlu0 %174 }
 0x14f   :  { %v178_v28 = vmul.f32 %v1020_v25, %v175_v27  ;;  %v169_v29 = vpop.permute.xlu1 %168 }
 0x150   :  { %v172_v30 = vmul.f32 %v1023_v26, %v169_v29 }
 0x152   :  { %v180_v31 = vadd.f32 %v178_v28, %v172_v30 }
 0x153   :  { %v171_v32 = vpop.permute.xlu1 %170 }
 0x154   :  { %v182_v33 = vadd.f32 %v180_v31, %v153_v17  ;;  %v173_v35 = vmul.f32 %v1023_v26, %v171_v32 }
 0x156   :  { %v196_v37 = vadd.f32 %v189_v22, %v182_v33 }
 0x157   :  { %v177_v34 = vpop.permute.xlu1 %176 }
 0x158   :  { %v179_v36 = vmul.f32 %v1020_v25, %v177_v34  ;;  %v198_v40 = vmul.f32 0.01, %v196_v37 }
 0x15a   :  { %v181_v38 = vadd.f32 %v179_v36, %v173_v35  ;;  %v200_v43 = vmax.f32 %v196_v37, %v198_v40 }
 0x15c   :  { %v183_v39 = vadd.f32 %v181_v38, %v156_v19  ;;  %v891_v38 = vld [vmem:[%s1183_s6 + $0x8] sm:$0xff]  }
 0x15e   :  { %v197_v41 = vadd.f32 %v194_v24, %v183_v39 }
 0x15f   :  { %v326_v2 = vpop.permute.xlu0 %325 }
 0x160   :  { %v199_v42 = vmul.f32 0.01, %v197_v41 }
 0x162   :  { %v201_v44 = vmax.f32 %v197_v41, %v199_v42 }
 0x164   :  { %v222_v45 = vpack.c.bf16 %v201_v44, %v200_v43  ;;  %v603_v43 = vld [vmem:[%s1184_s9] sm:$0xff] }
 0x166   :  { %823 = vmatpush3.bf16.msra.mxu1 %v222_v45  ;;  %v604_v45 = vld [vmem:[%s1184_s9 + $0x8] sm:$0xff] }
 0x167   :  { %846 = vmatprep.subr.bf16.mxu1 %v898_v10 }
 0x168   :  { %v331_v3 = vpop.permute.xlu1 %330 }
 0x169   :  { %825 = vmatmul.mubr.msk.bf16.vlgmr.msra.gmra.mrb[0].mxu1 %vm238_vm5, %v887_v46 }
 0x16a   :  { %828 = vmatprep.mubr.msk.bf16.mxu1 %vm901_vm2, %v898_v10 }
 0x171   :  { %829 = vmatmul.mubr.msk.bf16.gmra.mrb[4].mxu1 %vm238_vm5, %v888_v47 }
 0x172   :  { %832 = vmatprep.mubr.msk.bf16.mxu1 %vm901_vm2, %v898_v10 }
 0x179   :  { %833 = vmatmul.mubr.msk.bf16.gmra.mrb[8].mxu1 %vm238_vm5, %v889_v48 }
 0x17a   :  { %848 = vmatprep.mubr.msk.bf16.mxu1 %vm901_vm2, %v898_v10 }
 0x23c   :  { %v282_v49 = vpop.f32.mrb[0].mxu1 }
 0x23d   :  { %305 = vrot.lane.b32.xlu0 %v282_v49, %s900_s2  ;;  %v826_v50 = vpop.f32.mrb[1].mxu1 }
 0x23e   :  { %v285_v51 = vpop.f32.mrb[2].mxu1 }
 0x23f   :  { %307 = vrot.lane.b32.xlu1 %v285_v51, %s900_s2  ;;  %v827_v52 = vpop.f32.mrb[3].mxu1 }
 0x240   :  { %v754_v52 = vsel %vm53_vm6, 1.0, %v898_v10 }
 0x244   :  { %v290_v53 = vpop.f32.mrb[4].mxu1 }
 0x245   :  { %311 = vrot.lane.b32.xlu0 %v290_v53, %s899_s21  ;;  %v830_v54 = vpop.f32.mrb[5].mxu1 }
 0x246   :  { %v293_v55 = vpop.f32.mrb[6].mxu1 }
 0x247   :  { %313 = vrot.lane.b32.xlu1 %v293_v55, %s899_s21  ;;  %v831_v57 = vpop.f32.mrb[7].mxu1 }
 0x249   :  { %206 = vperm.xlu0 %881, %v202_v56  }
 0x24b   :  { %211 = vperm.xlu1 %882, %v203_v58  }
 0x24c   :  { %v298_v61 = vpop.f32.mrb[8].mxu1 }
 0x24d   :  { %471 = vperm.xlu0 %881, %v467_v59   ;;  %v834_v62 = vpop.f32.mrb[9].mxu1 }
 0x24e   :  { %v301_v63 = vpop.f32.mrb[10].mxu1 }
 0x24f   :  { %476 = vperm.xlu1 %882, %v468_v60   ;;  %v835_v0 = vpop.f32.mrb[11].mxu1 }
 0x2af   :  { %v306_v4 = vpop.permute.xlu0 %305 }
 0x2b0   :  { %v309_v7 = vmul.f32 %v1023_v26, %v306_v4 }
 0x2b1   :  { %v308_v5 = vpop.permute.xlu1 %307 }
 0x2b2   :  { %v310_v11 = vmul.f32 %v1023_v26, %v308_v5 }
 0x2b7   :  { %v312_v6 = vpop.permute.xlu0 %311 }
 0x2b8   :  { %v315_v8 = vmul.f32 %v1020_v25, %v312_v6 }
 0x2b9   :  { %v314_v9 = vpop.permute.xlu1 %313 }
 0x2ba   :  { %v316_v12 = vmul.f32 %v1020_v25, %v314_v9  ;;  %v317_v13 = vadd.f32 %v315_v8, %v309_v7  ;;  %v894_v7 = vld [vmem:[%s1185_s8] sm:$0xff]   ;;  %v895_v8 = vld [vmem:[%s1185_s8 + $0x8] sm:$0xff]   ;;  %v896_v9 = vld [vmem:[%s1185_s8 + $0x10] sm:$0xff]  }
 0x2bc   :  { %v318_v14 = vadd.f32 %v316_v12, %v310_v11  ;;  %v319_v15 = vadd.f32 %v317_v13, %v298_v61 }
 0x2be   :  { %v320_v17 = vadd.f32 %v318_v14, %v301_v63  ;;  %v333_v19 = vadd.f32 %v326_v2, %v319_v15 }
 0x2c0   :  { %v334_v20 = vadd.f32 %v331_v3, %v320_v17  ;;  %v335_v21 = vmul.f32 0.01, %v333_v19 }
 0x2c2   :  { %v336_v22 = vmul.f32 0.01, %v334_v20  ;;  %v337_v28 = vmax.f32 %v333_v19, %v335_v21 }
 0x2c4   :  { %v338_v32 = vmax.f32 %v334_v20, %v336_v22  ;;  %v485_v20 = vld [vmem:[%s1186_s10] sm:$0xff]  ;;  %v486_v22 = vld [vmem:[%s1186_s10 + $0x8] sm:$0xff] }
 0x2c8   :  { %v207_v24 = vpop.permute.xlu0 %206 }
 0x2c9   :  { %v214_v27 = vadd.f32 %v1005_v16, %v207_v24  ;;  %v892_v16 = vld [vmem:[%s1183_s6 + $0x10] sm:$0xff]  }
 0x2ca   :  { %v212_v29 = vpop.permute.xlu1 %211 }
 0x2cb   :  { %v339_v30 = vadd.f32 %v337_v28, %v214_v27  ;;  %v215_v31 = vadd.f32 %v1008_v18, %v212_v29  ;;  %v893_v18 = vld [vmem:[%s1183_s6 + $0x18] sm:$0xff]  }
 0x2cc   :  { %v472_v49 = vpop.permute.xlu0 %471 }
 0x2cd   :  { %v341_v33 = vmul.f32 0.01, %v339_v30  ;;  %v340_v34 = vadd.f32 %v338_v32, %v215_v31 }
 0x2ce   :  { %v477_v50 = vpop.permute.xlu1 %476 }
 0x2cf   :  { %v342_v25 = vmul.f32 0.01, %v340_v34  ;;  %v343_v35 = vmax.f32 %v339_v30, %v341_v33 }
 0x2d1   :  { %v344_v36 = vmax.f32 %v340_v34, %v342_v25 }
 0x2d3   :  { %v353_v37 = vpack.c.bf16 %v344_v36, %v343_v35 }
 0x2d5   :  { %836 = vmatprep.subr.bf16.mxu0 %v353_v37 }
 0x2d6   :  { %837 = vmatpush3.bf16.msra.mxu0 %v353_v37 }
 0x2d9   :  { %839 = vmatmul.mubr.msk.bf16.vlgmr.msra.gmra.mrb[8].mxu0 %vm238_vm5, %v891_v38 }
 0x2da   :  { %842 = vmatprep.mubr.msk.bf16.mxu0 %vm238_vm5, %v892_v16 }
 0x2e1   :  { %843 = vmatmul.mubr.msk.bf16.gmra.mrb[12].mxu0 %vm238_vm5, %v893_v18 }
 0x3ac   :  { %v840_v39 = vpop.f32.mrb[8].mxu0 }
 0x3ad   :  { %v420_v40 = vpop.f32.mrb[9].mxu0 }
 0x3ae   :  { %451 = vrot.lane.b32.xlu0 %v420_v40, %s902_s24  ;;  %v841_v41 = vpop.f32.mrb[10].mxu0 }
 0x3af   :  { %v423_v42 = vpop.f32.mrb[11].mxu0 }
 0x3b0   :  { %453 = vrot.lane.b32.xlu1 %v423_v42, %s902_s24 }
 0x3b2   :  { %457 = vrot.lane.b32.xlu0 %v840_v39, %s900_s2 }
 0x3b4   :  { %459 = vrot.lane.b32.xlu1 %v841_v41, %s900_s2  ;;  %v1093_v44 = vpop.f32.mrb[12].mxu0 }
 0x3b5   :  { %v436_v46 = vpop.f32.mrb[13].mxu0 }
 0x3b6   :  { %607 = vperm.xlu0 %881, %v603_v43   ;;  %v1098_v47 = vpop.f32.mrb[14].mxu0 }
 0x3b7   :  { %v439_v48 = vpop.f32.mrb[15].mxu0 }
 0x3b8   :  { %612 = vperm.xlu1 %882, %v604_v45  }
 0x420   :  { %v452_v51 = vpop.permute.xlu0 %451 }
 0x421   :  { %v455_v55 = vmul.f32 %v754_v52, %v452_v51 }
 0x422   :  { %v454_v53 = vpop.permute.xlu1 %453 }
 0x423   :  { %v456_v58 = vmul.f32 %v754_v52, %v454_v53 }
 0x424   :  { %v458_v54 = vpop.permute.xlu0 %457 }
 0x425   :  { %v461_v56 = vmul.f32 %v1023_v26, %v458_v54 }
 0x426   :  { %v460_v57 = vpop.permute.xlu1 %459 }
 0x427   :  { %v463_v59 = vadd.f32 %v461_v56, %v455_v55  ;;  %v462_v60 = vmul.f32 %v1023_v26, %v460_v57  ;;  %v783_v55 = vsel %vm627_vm7, 1.0, %v898_v10 }
 0x429   :  { %v465_v61 = vadd.f32 %v463_v59, %v436_v46  ;;  %v464_v62 = vadd.f32 %v462_v60, %v456_v58 }
 0x42b   :  { %v479_v63 = vadd.f32 %v472_v49, %v465_v61  ;;  %v466_v0 = vadd.f32 %v464_v62, %v439_v48 }
 0x42d   :  { %v481_v1 = vmul.f32 0.01, %v479_v63  ;;  %v480_v2 = vadd.f32 %v477_v50, %v466_v0  ;;  %v640_v0 = vld [vmem:[%s1187_s11 + $0x10] sm:$0xff] }
 0x42f   :  { %v482_v3 = vmul.f32 0.01, %v480_v2  ;;  %v483_v4 = vmax.f32 %v479_v63, %v481_v1  ;;  %v641_v1 = vld [vmem:[%s1187_s11 + $0x18] sm:$0xff] }
 0x431   :  { %v484_v5 = vmax.f32 %v480_v2, %v482_v3  ;;  %v643_v2 = vld [vmem:[%s1188_s12 + $0x8] sm:$0xff]  ;;  %v642_v3 = vld [vmem:[%s1188_s12] sm:$0xff] }
 0x433   :  { %v505_v6 = vpack.c.bf16 %v484_v5, %v483_v4 }
 0x435   :  { %847 = vmatpush3.bf16.msra.mxu1 %v505_v6  ;;  %v608_v30 = vpop.permute.xlu0 %607 }
 0x437   :  { %v613_v31 = vpop.permute.xlu1 %612 }
 0x438   :  { %849 = vmatmul.mubr.msk.bf16.vlgmr.msra.gmra.mrb[12].mxu1 %vm238_vm5, %v894_v7 }
 0x439   :  { %852 = vmatprep.mubr.msk.bf16.mxu1 %vm901_vm2, %v898_v10 }
 0x440   :  { %853 = vmatmul.mubr.msk.bf16.gmra.mrb[16].mxu1 %vm238_vm5, %v895_v8  ;;  %v645_v8 = vld [vmem:[%s1188_s12 + $0x18] sm:$0xff] }
 0x441   :  { %856 = vmatprep.mubr.msk.bf16.mxu1 %vm901_vm2, %v898_v10  ;;  %v639_v10 = vld [vmem:[%s1187_s11 + $0x8] sm:$0xff] }
 0x448   :  { %857 = vmatmul.mubr.msk.bf16.gmra.mrb[20].mxu1 %vm238_vm5, %v896_v9  ;;  %v644_v9 = vld [vmem:[%s1188_s12 + $0x10] sm:$0xff] }
 0x50b   :  { %v564_v11 = vpop.f32.mrb[12].mxu1 }
 0x50c   :  { %587 = vrot.lane.b32.xlu0 %v564_v11, %s902_s24  ;;  %v850_v12 = vpop.f32.mrb[13].mxu1 }
 0x50d   :  { %v567_v13 = vpop.f32.mrb[14].mxu1 }
 0x50e   :  { %589 = vrot.lane.b32.xlu1 %v567_v13, %s902_s24  ;;  %v851_v14 = vpop.f32.mrb[15].mxu1 }
 0x513   :  { %v572_v15 = vpop.f32.mrb[16].mxu1 }
 0x514   :  { %593 = vrot.lane.b32.xlu0 %v572_v15, %s900_s2  ;;  %v854_v17 = vpop.f32.mrb[17].mxu1 }
 0x515   :  { %v575_v19 = vpop.f32.mrb[18].mxu1 }
 0x516   :  { %595 = vrot.lane.b32.xlu1 %v575_v19, %s900_s2  ;;  %v855_v21 = vpop.f32.mrb[19].mxu1 }
 0x518   :  { %489 = vperm.xlu0 %881, %v485_v20  }
 0x51a   :  { %494 = vperm.xlu1 %882, %v486_v22  }
 0x51b   :  { %v580_v24 = vpop.f32.mrb[20].mxu1 }
 0x51c   :  { %v858_v27 = vpop.f32.mrb[21].mxu1 }
 0x51d   :  { %v583_v28 = vpop.f32.mrb[22].mxu1 }
 0x51e   :  { %v859_v29 = vpop.f32.mrb[23].mxu1 }
 0x57e   :  { %v588_v32 = vpop.permute.xlu0 %587 }
 0x57f   :  { %v591_v25 = vmul.f32 %v754_v52, %v588_v32 }
 0x580   :  { %v590_v33 = vpop.permute.xlu1 %589 }
 0x581   :  { %v592_v37 = vmul.f32 %v754_v52, %v590_v33 }
 0x586   :  { %v594_v34 = vpop.permute.xlu0 %593 }
 0x587   :  { %v597_v35 = vmul.f32 %v1023_v26, %v594_v34 }
 0x588   :  { %v596_v36 = vpop.permute.xlu1 %595 }
 0x589   :  { %v598_v38 = vmul.f32 %v1023_v26, %v596_v36  ;;  %v599_v16 = vadd.f32 %v597_v35, %v591_v25 }
 0x58b   :  { %v600_v18 = vadd.f32 %v598_v38, %v592_v37  ;;  %v601_v39 = vadd.f32 %v599_v16, %v580_v24 }
 0x58d   :  { %v602_v40 = vadd.f32 %v600_v18, %v583_v28  ;;  %v615_v41 = vadd.f32 %v608_v30, %v601_v39 }
 0x58f   :  { %v616_v42 = vadd.f32 %v613_v31, %v602_v40  ;;  %v617_v43 = vmul.f32 0.01, %v615_v41 }
 0x591   :  { %v618_v45 = vmul.f32 0.01, %v616_v42  ;;  %v619_v49 = vmax.f32 %v615_v41, %v617_v43 }
 0x593   :  { %v620_v54 = vmax.f32 %v616_v42, %v618_v45 }
 0x597   :  { %v490_v46 = vpop.permute.xlu0 %489 }
 0x598   :  { %v497_v48 = vadd.f32 %v1093_v44, %v490_v46  ;;  %v638_v44 = vld [vmem:[%s1187_s11] sm:$0xff] }
 0x599   :  { %v495_v50 = vpop.permute.xlu1 %494  ;;  %864 = vmatprep.mubr.msk.f32.mxu0 %vm238_vm5, %v638_v44 }
 0x59a   :  { %v621_v51 = vadd.f32 %v619_v49, %v497_v48  ;;  %v498_v53 = vadd.f32 %v1098_v47, %v495_v50 }
 0x59c   :  { %v623_v26 = vmul.f32 0.01, %v621_v51  ;;  %v622_v52 = vadd.f32 %v620_v54, %v498_v53 }
 0x59e   :  { %v624_v56 = vmul.f32 0.01, %v622_v52  ;;  %v625_v57 = vmax.f32 %v621_v51, %v623_v26 }
 0x5a0   :  { %v630_v58 = vmul.f32 %v783_v55, %v625_v57  ;;  %v626_v59 = vmax.f32 %v622_v52, %v624_v56 }
 0x5a2   :  { %632 = vadd.xlane.f32.xlu0 %v630_v58  ;;  %v631_v60 = vmul.f32 %v783_v55, %v626_v59 }
 0x5a4   :  { %634 = vadd.xlane.f32.xlu1 %v631_v60 }
 0x62f   :  { %v633_v47 = vpop.xlane.xlu0 %632 }
 0x630   :  { %v636_v23 = vmul.f32 0.0625, %v633_v47 }
 0x631   :  { %v635_v61 = vpop.xlane.xlu1 %634 }
 0x632   :  { %v637_v62 = vmul.f32 0.0625, %v635_v61 }
 0x634   :  { %v870_v63 = vpack.c.bf16 %v637_v62, %v636_v23 }
 0x636   :  { %871 = vmatprep.subr.bf16.mxu0 %v870_v63 }
 0x637   :  { %873 = vmatpush3.bf16.msra.mxu0 %v870_v63 }
 0x63a   :  { %865 = vmatmul.mubr.msk.f32.vlgmr.msra.gmra.mrb[16].mxu0 %vm238_vm5, %v639_v10 }
 0x63b   :  { %867 = vmatprep.mubr.msk.f32.mxu0 %vm238_vm5, %v640_v0 }
 0x63e   :  { %868 = vmatmul.mubr.msk.f32.gmra.mrb[18].mxu0 %vm238_vm5, %v641_v1 }
 0x70d   :  { %v866_v4 = vpop.f32.mrb[16].mxu0 }
 0x70e   :  { %v730_v5 = vadd.f32 %v866_v4, %v643_v2  ;;  %v724_v6 = vpop.f32.mrb[17].mxu0 }
 0x70f   :  { %v725_v7 = vadd.f32 %v724_v6, %v642_v3 }
 0x710   :  { %745 = vst.msk [vmem:[%s1189_s13 + $0x8] sm:$0xff] %vm743_vm8, %v730_v5 }
 0x711   :  { %744 = vst.msk [vmem:[%s1189_s13] sm:$0xff] %vm743_vm8, %v725_v7  ;;  %v869_v11 = vpop.f32.mrb[18].mxu0 }
 0x712   :  { %v740_v12 = vadd.f32 %v869_v11, %v645_v8  ;;  %v734_v13 = vpop.f32.mrb[19].mxu0 }
 0x713   :  { %v735_v14 = vadd.f32 %v734_v13, %v644_v9 }
 0x714   :  { %747 = vst.msk [vmem:[%s1189_s13 + $0x18] sm:$0xff] %vm743_vm8, %v740_v12 }
 0x715   :  { %746 = vst.msk [vmem:[%s1189_s13 + $0x10] sm:$0xff] %vm743_vm8, %v735_v14 }

</bundles_post_ra>
